<compile_context>
chip_gen: v7x
topology: tpu7x:2x2x1
jax: 0.10.0
libtpu: 0.0.40
codegen_flags: <defaults>
</compile_context>

<pallas_src>
from functools import partial

import jax
import jax.numpy as jnp
from jax import lax
from jax.experimental import pallas as pl
from jax.experimental.pallas import tpu as pltpu

BN_EPS = 1e-5


def _round_up(x, m):
    return (x + m - 1) // m * m


# ---------------------------------------------------------------------------
# Pass 1: tiled conv matmul (f32 VMEM accumulator, bf16 HBM intermediate)
#         + per-tile BN partial statistics taken from the f32 accumulator.
# ---------------------------------------------------------------------------
def _conv_stats_kernel(tk, cols_ref, w_ref, conv_ref, stats_ref, acc_ref):
    kk = pl.program_id(2)

    # Weight stays VMEM-resident (constant index_map); slice the K tile here.
    if tk == w_ref.shape[0]:
        w_blk = w_ref[...]
    else:
        k0 = pl.multiple_of(kk * tk, tk)
        w_blk = w_ref[pl.ds(k0, tk), :]

    # (tm, tk) @ (tk, Cp) on the MXU, bf16 operands, f32 accumulate.
    part = jnp.dot(cols_ref[0], w_blk, preferred_element_type=jnp.float32)

    @pl.when(kk == 0)
    def _():
        acc_ref[...] = part          # write directly, no zero-fill + add

    @pl.when(kk > 0)
    def _():
        acc_ref[...] += part

    @pl.when(kk == pl.num_programs(2) - 1)
    def _():
        acc = acc_ref[...]
        conv_ref[0] = acc.astype(conv_ref.dtype)              # bf16 to HBM
        s = jnp.sum(acc, axis=0, keepdims=True)               # (1, Cp)
        sq = jnp.sum(acc * acc, axis=0, keepdims=True)        # (1, Cp)
        stats_ref[...] = jnp.concatenate([s, sq], axis=0)[None, None]


# ---------------------------------------------------------------------------
# Pass 2: folded BN affine + per-channel PReLU; writes the channel-major
#         (Cp, rows) layout directly so no XLA NCHW transpose is needed.
# ---------------------------------------------------------------------------
def _bn_prelu_nchw_kernel(linear, conv_ref, params_ref, o_ref):
    x = conv_ref[0].astype(jnp.float32)     # bf16 intermediate -> f32 math
    scale = params_ref[0:1, :]              # (1, Cp)
    bias = params_ref[1:2, :]
    y = x * scale + bias
    if not linear:
        alpha = params_ref[2:3, :]
        y = jnp.where(y >= 0.0, y, alpha * y)
    # XLU tile transpose (different issue slot; hidden under the mem-bound DMA).
    o_ref[0] = jnp.transpose(y, (1, 0)).astype(o_ref.dtype)   # (Cp, tm2)


# ---------------------------------------------------------------------------
# Forward (jitted): NCHW in, NCHW out, matching the PyTorch module semantics.
# ---------------------------------------------------------------------------
def _conv_block_forward(x, weight, gamma, beta, alpha, *, k, s, p, linear):
    N, Cin, H, W = x.shape
    Cout = weight.shape[0]
    Hout = (H + 2 * p - k) // s + 1
    Wout = (W + 2 * p - k) // s + 1

    Mhw = Hout * Wout          # rows per batch image
    M = N * Mhw                # true element count for BN statistics
    K = k * k * Cin

    # ---- tile sizes / lane padding ----
    Cp = _round_up(Cout, 128)                       # lane-dense output channels
    Kp = _round_up(K, 128)
    tk = 512 if Kp % 512 == 0 else (256 if Kp % 256 == 0 else 128)
    n_kt = Kp // tk

    tm = min(512, _round_up(Mhw, 16))
    if N == 1 and 16 <= Mhw <= tm:
        # v7x: 2 TensorCores shard the parallel axes -> keep >= 2 M tiles.
        tm = _round_up((Mhw + 1) // 2, 16)
    Mhw_p = _round_up(Mhw, tm)
    n_mt = Mhw_p // tm

    # Pass-2 row tile: decoupled and larger (pure elementwise pass), chosen as
    # a multiple of tm that divides Mhw_p exactly.
    f = 1
    for cand in range(min(n_mt, max(1, 2048 // tm)), 0, -1):
        if n_mt % cand == 0:
            f = cand
            break
    tm2 = tm * f
    n_mt2 = n_mt // f

    # ---- glue: NCHW -> NHWC (bf16 *before* patch extraction), im2col ----
    # TODO(synk): fuse the patch extraction into Pass 1 (k*k shifted-window
    # matmuls via manual DMA from an NHWC-padded x kept in pl.ANY) to remove
    # the k^2-fold im2col HBM expansion entirely.
    # TODO(synk): for small Cout, pack several output-width positions per
    # 128-lane group instead of zero-padding Cout straight to 128.
    x_nhwc = jnp.transpose(x, (0, 2, 3, 1)).astype(jnp.bfloat16)
    x_pad = jnp.pad(x_nhwc, ((0, 0), (p, p), (p, p), (0, 0)))
    patches = [x_pad[:, kh:kh + s * Hout:s, kw:kw + s * Wout:s, :]
               for kh in range(k) for kw in range(k)]
    cols = jnp.concatenate(patches, axis=-1).reshape(N, Mhw, K)
    cols = jnp.pad(cols, ((0, 0), (0, Mhw_p - Mhw), (0, Kp - K)))

    # weight (Cout, Cin, k, k) -> (kh, kw, cin, cout) -> (K, Cout), padded bf16
    w2 = jnp.transpose(weight, (2, 3, 1, 0)).reshape(K, Cout)
    w2 = jnp.pad(w2, ((0, Kp - K), (0, Cp - Cout))).astype(jnp.bfloat16)

    # ---- Pass 1: conv tiles + per-tile partial statistics ----
    cost1 = pl.CostEstimate(
        flops=2 * N * Mhw_p * Kp * Cp,
        transcendentals=0,
        bytes_accessed=(N * Mhw_p * Kp * 2      # cols (bf16)
                        + Kp * Cp * 2           # weight fetched once (resident)
                        + N * Mhw_p * Cp * 2    # conv intermediate (bf16)
                        + N * n_mt * 2 * Cp * 4),
    )
    conv_out, stats = pl.pallas_call(
        partial(_conv_stats_kernel, tk),
        out_shape=(jax.ShapeDtypeStruct((N, Mhw_p, Cp), jnp.bfloat16),
                   jax.ShapeDtypeStruct((N, n_mt, 2, Cp), jnp.float32)),
        grid=(N, n_mt, n_kt),
        in_specs=[
            pl.BlockSpec((1, tm, tk), lambda n, i, kk: (n, i, kk)),
            pl.BlockSpec((Kp, Cp), lambda n, i, kk: (0, 0)),   # VMEM-resident
        ],
        out_specs=(
            pl.BlockSpec((1, tm, Cp), lambda n, i, kk: (n, i, 0)),
            pl.BlockSpec((1, 1, 2, Cp), lambda n, i, kk: (n, i, 0, 0)),
        ),
        scratch_shapes=[pltpu.VMEM((tm, Cp), jnp.float32)],    # f32 accumulator
        compiler_params=pltpu.CompilerParams(
            dimension_semantics=("parallel", "parallel", "arbitrary"),
            vmem_limit_bytes=32 * 1024 * 1024,
        ),
        cost_estimate=cost1,
    )(cols, w2)

    # ---- tiny XLA glue: finalize global batch stats, fold BN to scale/bias ----
    total = jnp.sum(stats, axis=(0, 1))                   # (2, Cp)
    mean = total[0] / M                                   # true M (zero-padded rows add 0)
    # NOTE: E[x^2]-mean^2 in f32 can cancel if |mean| >> std; fine for conv
    # activations here.  Switch to a Welford-style per-tile combine if tighter
    # tolerances are needed at scale.
    var = jnp.maximum(total[1] / M - mean * mean, 0.0)    # biased variance
    inv_std = lax.rsqrt(var + BN_EPS)

    gamma_p = jnp.pad(gamma, (0, Cp - Cout))
    beta_p = jnp.pad(beta, (0, Cp - Cout))
    alpha_p = jnp.pad(alpha, (0, Cp - Cout))
    scale = gamma_p * inv_std
    bias = beta_p - mean * scale
    params = (jnp.zeros((8, Cp), jnp.float32)
              .at[0].set(scale).at[1].set(bias).at[2].set(alpha_p))

    # ---- Pass 2: elementwise BN affine + PReLU, channel-major output ----
    cost2 = pl.CostEstimate(
        flops=5 * N * Mhw_p * Cp,
        transcendentals=0,
        bytes_accessed=N * Mhw_p * Cp * (2 + 4) + 8 * Cp * 4,
    )
    out_cm = pl.pallas_call(
        partial(_bn_prelu_nchw_kernel, linear),
        out_shape=jax.ShapeDtypeStruct((N, Cp, Mhw_p), jnp.float32),
        grid=(N, n_mt2),
        in_specs=[
            pl.BlockSpec((1, tm2, Cp), lambda n, j: (n, j, 0)),
            pl.BlockSpec((8, Cp), lambda n, j: (0, 0)),  # resident params block
        ],
        out_specs=pl.BlockSpec((1, Cp, tm2), lambda n, j: (n, 0, j)),
        compiler_params=pltpu.CompilerParams(
            dimension_semantics=("parallel", "parallel"),
            vmem_limit_bytes=32 * 1024 * 1024,
        ),
        cost_estimate=cost2,
    )(conv_out, params)

    # ---- glue: slice off padding + reshape only (no XLA transpose) ----
    return out_cm[:, :Cout, :Mhw].reshape(N, Cout, Hout, Wout)


_conv_block_forward_jit = jax.jit(
    _conv_block_forward, static_argnames=("k", "s", "p", "linear"))


class ConvBlockPallas:
    """Pallas equivalent of networks/mobilenet_small.py::ConvBlock (dw=False)."""

    def __init__(self, inp, oup, k, s, p, dw=False, linear=False, key=None):
        if dw:
            # TODO(synk): depthwise (groups=inp) conv path not implemented.
            raise NotImplementedError("dw=True (grouped conv) not implemented")
        self.inp, self.oup, self.k, self.s, self.p = inp, oup, k, s, p
        self.linear = linear
        key = jax.random.PRNGKey(0) if key is None else key
        fan_in = inp * k * k
        # deterministic init, kaiming-ish scale (nn.Conv2d weight shape (oup, inp, k, k))
        self.weight = (jax.random.normal(key, (oup, inp, k, k), jnp.float32)
                       * (1.0 / jnp.sqrt(fan_in)))
        self.gamma = jnp.ones((oup,), jnp.float32)          # BN weight default
        self.beta = jnp.zeros((oup,), jnp.float32)          # BN bias default
        self.alpha = jnp.full((oup,), 0.25, jnp.float32)    # PReLU default init

    def __call__(self, x):
        return _conv_block_forward_jit(
            x, self.weight, self.gamma, self.beta, self.alpha,
            k=self.k, s=self.s, p=self.p, linear=self.linear)


# ---------------------------------------------------------------------------
# Pure-JAX reference (training-mode BN with batch stats, biased variance).
# quantize=True mirrors the kernel's bf16 conv intermediate (stats from f32).
# ---------------------------------------------------------------------------
def _reference(x, weight, gamma, beta, alpha, s, p, linear, *, quantize=False):
    conv = lax.conv_general_dilated(
        x, weight, window_strides=(s, s), padding=[(p, p), (p, p)],
        dimension_numbers=("NCHW", "OIHW", "NCHW"),
        precision=lax.Precision.HIGHEST)
    mean = conv.mean(axis=(0, 2, 3), keepdims=True)
    var = jnp.square(conv - mean).mean(axis=(0, 2, 3), keepdims=True)
    if quantize:
        conv = conv.astype(jnp.bfloat16).astype(jnp.float32)
    y = (conv - mean) / jnp.sqrt(var + BN_EPS) * gamma.reshape(1, -1, 1, 1) \
        + beta.reshape(1, -1, 1, 1)
    if not linear:
        a = alpha.reshape(1, -1, 1, 1)
        y = jnp.where(y >= 0, y, a * y)
    return y


if __name__ == "__main__":
    key = jax.random.PRNGKey(0)
    kx, kw = jax.random.split(key)

    N, Cin, H, W = 2, 4, 16, 16
    Cout, k, s, p = 8, 3, 1, 1

    x = jax.random.normal(kx, (N, Cin, H, W), jnp.float32)

    block = ConvBlockPallas(Cin, Cout, k, s, p, dw=False, linear=False, key=kw)
    out = jax.block_until_ready(block(x))
    assert out.shape == (N, Cout, H, W), out.shape

    # Tight-ish check: reference fed the same bf16-rounded operands AND the
    # same bf16-rounded conv intermediate the kernel uses (residual diffs are
    # f32 accumulation order + rare one-ulp rounding-boundary flips).
    x_q = x.astype(jnp.bfloat16).astype(jnp.float32)
    w_q = block.weight.astype(jnp.bfloat16).astype(jnp.float32)
    ref_q = _reference(x_q, w_q, block.gamma, block.beta, block.alpha,
                       s, p, block.linear, quantize=True)
    assert jnp.allclose(out, ref_q, atol=3e-2, rtol=3e-2), \
        float(jnp.max(jnp.abs(out - ref_q)))

    # Loose sanity bound against the full-f32 reference (operand + intermediate
    # bf16 quantization).
    ref_f32 = _reference(x, block.weight, block.gamma, block.beta, block.alpha,
                         s, p, block.linear)
    assert jnp.allclose(out, ref_f32, atol=1e-1, rtol=1e-1), \
        float(jnp.max(jnp.abs(out - ref_f32)))

    print("KERNEL_OK")
</pallas_src>

<mosaic_0001>
module attributes {stable_mosaic.version = 11 : i64} {
  func.func @_conv_stats_kernel(%arg0: i32, %arg1: i32, %arg2: i32, %arg3: memref<1x256x128xbf16, #tpu.memory_space<vmem>>, %arg4: memref<128x128xbf16, #tpu.memory_space<vmem>>, %arg5: memref<1x256x128xbf16, #tpu.memory_space<vmem>>, %arg6: memref<1x1x2x128xf32, #tpu.memory_space<vmem>>, %arg7: memref<256x128xf32, #tpu.memory_space<vmem>>) attributes {dimension_semantics = [#tpu.dimension_semantics<parallel>, #tpu.dimension_semantics<parallel>, #tpu.dimension_semantics<arbitrary>], iteration_bounds = array<i64: 2, 1, 1>, scalar_prefetch = 0 : i64, scratch_operands = 1 : i64, tpu.core_type = #tpu.core_type<tc>, window_params = [{transform_indices = @transform_0, window_bounds = array<i64: 1, 256, 128>}, {pipeline_mode = #tpu.pipeline_mode<synchronous>, transform_indices = @transform_1, window_bounds = array<i64: 128, 128>}, {transform_indices = @transform_2, window_bounds = array<i64: 1, 256, 128>}, {transform_indices = @transform_3, window_bounds = array<i64: 1, 1, 2, 128>}]} {
    %c0 = arith.constant 0 : index
    %c0_0 = arith.constant 0 : index
    %0 = vector.load %arg4[%c0, %c0_0] : memref<128x128xbf16, #tpu.memory_space<vmem>>, vector<128x128xbf16>
    %c0_1 = arith.constant 0 : index
    %c0_2 = arith.constant 0 : index
    %c0_3 = arith.constant 0 : index
    %1 = vector.load %arg3[%c0_1, %c0_2, %c0_3] : memref<1x256x128xbf16, #tpu.memory_space<vmem>>, vector<1x256x128xbf16>
    %2 = vector.shape_cast %1 : vector<1x256x128xbf16> to vector<256x128xbf16>
    %cst = arith.constant dense<0.000000e+00> : vector<256x128xf32>
    %3 = tpu.matmul %2, %0, %cst {dimension_numbers = #tpu.dot_dimension_numbers<[1], [0], [0], [1], [0, 0, 1, 1], [], []>} : vector<256x128xbf16>, vector<128x128xbf16>, vector<256x128xf32> -> vector<256x128xf32>
    %c0_i32 = arith.constant 0 : i32
    %4 = arith.cmpi eq, %arg2, %c0_i32 : i32
    %5 = arith.extui %4 : i1 to i32
    %c0_i32_4 = arith.constant 0 : i32
    %6 = arith.cmpi ne, %5, %c0_i32_4 : i32
    scf.if %6 {
      %c0_9 = arith.constant 0 : index
      %c0_10 = arith.constant 0 : index
      %13 = vector.load %arg7[%c0_9, %c0_10] : memref<256x128xf32, #tpu.memory_space<vmem>>, vector<256x128xf32>
      tpu.vector_store %arg7[%c0_9, %c0_10], %3 {strides = array<i32>} : memref<256x128xf32, #tpu.memory_space<vmem>>, vector<256x128xf32>,
    } else {
    }
    %c0_i32_5 = arith.constant 0 : i32
    %7 = arith.cmpi sgt, %arg2, %c0_i32_5 : i32
    %8 = arith.extui %7 : i1 to i32
    %c0_i32_6 = arith.constant 0 : i32
    %9 = arith.cmpi ne, %8, %c0_i32_6 : i32
    scf.if %9 {
      %c0_9 = arith.constant 0 : index
      %c0_10 = arith.constant 0 : index
      %13 = vector.load %arg7[%c0_9, %c0_10] : memref<256x128xf32, #tpu.memory_space<vmem>>, vector<256x128xf32>
      %14 = arith.addf %13, %3 : vector<256x128xf32>
      %c0_11 = arith.constant 0 : index
      %c0_12 = arith.constant 0 : index
      %15 = vector.load %arg7[%c0_11, %c0_12] : memref<256x128xf32, #tpu.memory_space<vmem>>, vector<256x128xf32>
      tpu.vector_store %arg7[%c0_11, %c0_12], %14 {strides = array<i32>} : memref<256x128xf32, #tpu.memory_space<vmem>>, vector<256x128xf32>,
    } else {
    }
    %c0_i32_7 = arith.constant 0 : i32
    %10 = arith.cmpi eq, %arg2, %c0_i32_7 : i32
    %11 = arith.extui %10 : i1 to i32
    %c0_i32_8 = arith.constant 0 : i32
    %12 = arith.cmpi ne, %11, %c0_i32_8 : i32
    scf.if %12 {
      %c0_9 = arith.constant 0 : index
      %c0_10 = arith.constant 0 : index
      %13 = vector.load %arg7[%c0_9, %c0_10] : memref<256x128xf32, #tpu.memory_space<vmem>>, vector<256x128xf32>
      %14 = arith.truncf %13 : vector<256x128xf32> to vector<256x128xbf16>
      %c0_11 = arith.constant 0 : index
      %c0_12 = arith.constant 0 : index
      %c0_13 = arith.constant 0 : index
      %15 = vector.load %arg5[%c0_11, %c0_12, %c0_13] : memref<1x256x128xbf16, #tpu.memory_space<vmem>>, vector<1x256x128xbf16>
      %16 = vector.shape_cast %15 : vector<1x256x128xbf16> to vector<256x128xbf16>
      %17 = vector.shape_cast %14 : vector<256x128xbf16> to vector<1x256x128xbf16>
      tpu.vector_store %arg5[%c0_11, %c0_12, %c0_13], %17 {strides = array<i32>} : memref<1x256x128xbf16, #tpu.memory_space<vmem>>, vector<1x256x128xbf16>,
      %cst_14 = arith.constant dense<0.000000e+00> : vector<128xf32>
      %18 = vector.multi_reduction <add>, %13, %cst_14 [0] : vector<256x128xf32> to vector<128xf32>
      %19 = vector.shape_cast %18 : vector<128xf32> to vector<1x128xf32>
      %20 = arith.mulf %13, %13 : vector<256x128xf32>
      %cst_15 = arith.constant dense<0.000000e+00> : vector<128xf32>
      %21 = vector.multi_reduction <add>, %20, %cst_15 [0] : vector<256x128xf32> to vector<128xf32>
      %22 = vector.shape_cast %21 : vector<128xf32> to vector<1x128xf32>
      %23 = tpu.concatenate %19, %22 in 0 : vector<1x128xf32>, vector<1x128xf32> -> vector<2x128xf32>
      %24 = vector.shape_cast %23 : vector<2x128xf32> to vector<1x1x2x128xf32>
      %c0_16 = arith.constant 0 : index
      %c0_17 = arith.constant 0 : index
      %c0_18 = arith.constant 0 : index
      %c0_19 = arith.constant 0 : index
      %25 = vector.load %arg6[%c0_16, %c0_17, %c0_18, %c0_19] : memref<1x1x2x128xf32, #tpu.memory_space<vmem>>, vector<1x1x2x128xf32>
      tpu.vector_store %arg6[%c0_16, %c0_17, %c0_18, %c0_19], %24 {strides = array<i32>} : memref<1x1x2x128xf32, #tpu.memory_space<vmem>>, vector<1x1x2x128xf32>,
    } else {
    }
    return
  }
  func.func @transform_0(%arg0: i32, %arg1: i32, %arg2: i32) -> (i32, i32, i32) {
    %c0_i32 = arith.constant 0 : i32
    return %arg0, %arg1, %arg2 : i32, i32, i32
  }
  func.func @transform_1(%arg0: i32, %arg1: i32, %arg2: i32) -> (i32, i32) {
    %c0_i32 = arith.constant 0 : i32
    %c0_i32_0 = arith.constant 0 : i32
    %c0_i32_1 = arith.constant 0 : i32
    return %c0_i32, %c0_i32_0 : i32, i32
  }
  func.func @transform_2(%arg0: i32, %arg1: i32, %arg2: i32) -> (i32, i32, i32) {
    %c0_i32 = arith.constant 0 : i32
    %c0_i32_0 = arith.constant 0 : i32
    return %arg0, %arg1, %c0_i32 : i32, i32, i32
  }
  func.func @transform_3(%arg0: i32, %arg1: i32, %arg2: i32) -> (i32, i32, i32, i32) {
    %c0_i32 = arith.constant 0 : i32
    %c0_i32_0 = arith.constant 0 : i32
    %c0_i32_1 = arith.constant 0 : i32
    return %arg0, %arg1, %c0_i32, %c0_i32_0 : i32, i32, i32, i32
  }
}

module attributes {stable_mosaic.version = 11 : i64} {
  func.func @_bn_prelu_nchw_kernel(%arg0: i32, %arg1: i32, %arg2: memref<1x256x128xbf16, #tpu.memory_space<vmem>>, %arg3: memref<8x128xf32, #tpu.memory_space<vmem>>, %arg4: memref<1x128x256xf32, #tpu.memory_space<vmem>>) attributes {dimension_semantics = [#tpu.dimension_semantics<parallel>, #tpu.dimension_semantics<parallel>], iteration_bounds = array<i64: 2, 1>, scalar_prefetch = 0 : i64, scratch_operands = 0 : i64, tpu.core_type = #tpu.core_type<tc>, window_params = [{transform_indices = @transform_0, window_bounds = array<i64: 1, 256, 128>}, {pipeline_mode = #tpu.pipeline_mode<synchronous>, transform_indices = @transform_1, window_bounds = array<i64: 8, 128>}, {transform_indices = @transform_2, window_bounds = array<i64: 1, 128, 256>}]} {
    %c0 = arith.constant 0 : index
    %c0_0 = arith.constant 0 : index
    %c0_1 = arith.constant 0 : index
    %0 = vector.load %arg2[%c0, %c0_0, %c0_1] : memref<1x256x128xbf16, #tpu.memory_space<vmem>>, vector<1x256x128xbf16>
    %1 = vector.shape_cast %0 : vector<1x256x128xbf16> to vector<256x128xbf16>
    %2 = arith.extf %1 : vector<256x128xbf16> to vector<256x128xf32>
    %c0_2 = arith.constant 0 : index
    %c0_3 = arith.constant 0 : index
    %3 = vector.load %arg3[%c0_2, %c0_3] : memref<8x128xf32, #tpu.memory_space<vmem>>, vector<1x128xf32>
    %c1 = arith.constant 1 : index
    %c0_4 = arith.constant 0 : index
    %4 = vector.load %arg3[%c1, %c0_4] : memref<8x128xf32, #tpu.memory_space<vmem>>, vector<1x128xf32>
    %5 = vector.broadcast %3 : vector<1x128xf32> to vector<256x128xf32>
    %6 = arith.mulf %2, %5 : vector<256x128xf32>
    %7 = vector.broadcast %4 : vector<1x128xf32> to vector<256x128xf32>
    %8 = arith.addf %6, %7 : vector<256x128xf32>
    %c2 = arith.constant 2 : index
    %c0_5 = arith.constant 0 : index
    %9 = vector.load %arg3[%c2, %c0_5] : memref<8x128xf32, #tpu.memory_space<vmem>>, vector<1x128xf32>
    %cst = arith.constant 0.000000e+00 : f32
    %10 = vector.broadcast %cst : f32 to vector<256x128xf32>
    %11 = arith.cmpf oge, %8, %10 : vector<256x128xf32>
    %12 = vector.broadcast %9 : vector<1x128xf32> to vector<256x128xf32>
    %13 = arith.mulf %12, %8 : vector<256x128xf32>
    %14 = arith.select %11, %8, %13 : vector<256x128xi1>, vector<256x128xf32>
    %15 = tpu.transpose %14, [1, 0] : vector<256x128xf32> -> vector<128x256xf32>
    %c0_6 = arith.constant 0 : index
    %c0_7 = arith.constant 0 : index
    %c0_8 = arith.constant 0 : index
    %16 = vector.load %arg4[%c0_6, %c0_7, %c0_8] : memref<1x128x256xf32, #tpu.memory_space<vmem>>, vector<1x128x256xf32>
    %17 = vector.shape_cast %16 : vector<1x128x256xf32> to vector<128x256xf32>
    %18 = vector.shape_cast %15 : vector<128x256xf32> to vector<1x128x256xf32>
    tpu.vector_store %arg4[%c0_6, %c0_7, %c0_8], %18 {strides = array<i32>} : memref<1x128x256xf32, #tpu.memory_space<vmem>>, vector<1x128x256xf32>,
    return
  }
  func.func @transform_0(%arg0: i32, %arg1: i32) -> (i32, i32, i32) {
    %c0_i32 = arith.constant 0 : i32
    %c0_i32_0 = arith.constant 0 : i32
    return %arg0, %arg1, %c0_i32 : i32, i32, i32
  }
  func.func @transform_1(%arg0: i32, %arg1: i32) -> (i32, i32) {
    %c0_i32 = arith.constant 0 : i32
    %c0_i32_0 = arith.constant 0 : i32
    %c0_i32_1 = arith.constant 0 : i32
    return %c0_i32, %c0_i32_0 : i32, i32
  }
  func.func @transform_2(%arg0: i32, %arg1: i32) -> (i32, i32, i32) {
    %c0_i32 = arith.constant 0 : i32
    %c0_i32_0 = arith.constant 0 : i32
    return %arg0, %c0_i32, %arg1 : i32, i32, i32
  }
}

</mosaic_0001>

<bundles_post_ra>
// kernel: _conv_block_forward.3
= control target key start
LH: loop header
LB: loop body
LE: loop exit
PB: predicated region body
PF: predicated region fallthrough
CT: control target
= control target key end

     0   :  { %s763_s9 = smov 0   ;;  %s765_s10 = smov 0   ;;  %s966_s0 = inlined_call_operand.vmem [shape: bf16[2,256,128], index: 0, kind: input, shape index: {}]   ;;  %s967_s1 = inlined_call_operand.vmem [shape: f32[8,128], index: 1, kind: input, shape index: {}]   ;;  %s968_s2 = inlined_call_operand.vmem [shape: f32[2,128,256], index: 2, kind: output, shape index: {}]  }
   0x1   :  { %s767_s11 = smov 0  }
   0x2 LB: > { %s24_s12 = sadd.s32 1, %s742_s10  ;;  %p609_p0 = scmp.ge.s32.totalorder %s746_s11, 1  ;;  %s746_s11 = sphi %s767_s11, %s12_s11   ;;  %s742_s10 = sphi %s765_s10, %s970_s10   ;;  %s738_s9 = sphi %s763_s9, %s969_s9  }
   0x3   : > { %p26_p1 = scmp.ge.s32.totalorder %s24_s12, 2  ;;  %p133_p2 = scmp.lt.s32.totalorder %s746_s11, 3 }
   0x5   : > { %s972_s12 = smov (%p26_p1, %s24_s12), 0  ;;  %p134_p3 = pnand %p609_p0, %p133_p2 }
   0x6   : > { %p164_p4 = scmp.lt.s32.totalorder (!%p134_p3), %s738_s9, 1  ;;  %v792_v0 = vld [vmem:[%s967_s1] ss:$0 sm:$0xff] (!%p134_p3)  ;;  %v801_v9 = vld [vmem:[%s967_s1 + $0x1] ss:$0 sm:$0xff] (!%p134_p3) }
   0x7   : > { %137 = sbr.rel (%p134_p3) target bundleno = 218 (0xda), region = 28  ;;  %v810_v18 = vld [vmem:[%s967_s1 + $0x2] ss:$0 sm:$0xff] (!%p134_p3) }
   0xe   : > { %s974_s9 = smov (!%p164_p4, %s738_s9), 1 }
   0xf   : > { %s619_s13 = sshll.u32 %s974_s9, 7  ;;  %s620_s23 = sshll.u32 %s974_s9, 8 }
  0x10   : > { %s787_s16 = scalar_lea.vmem %s966_s0, %s619_s13  ;;  %s923_s26 = scalar_lea.vmem %s968_s2, %s620_s23 }
  0x11   : > { %v692_v1 = vld [vmem:[%s787_s16 + $0x40] sm:$0xff]   ;;  %v693_v3 = vld [vmem:[%s787_s16 + $0x48] sm:$0xff]   ;;  %v694_v37 = vld [vmem:[%s787_s16 + $0x50] sm:$0xff]  }
  0x12   : > { %v622_v2 = vld [vmem:[%s787_s16] sm:$0xff]   ;;  %v655_v4 = vunpack.c.l.bf16 %v692_v1  ;;  %v656_v6 = vunpack.c.h.bf16 %v692_v1  ;;  %v685_v8 = vld [vmem:[%s787_s16 + $0x8] sm:$0xff]   ;;  %v659_v10 = vunpack.c.l.bf16 %v693_v3  ;;  %v660_v12 = vunpack.c.h.bf16 %v693_v3  ;;  %v686_v38 = vld [vmem:[%s787_s16 + $0x10] sm:$0xff]  }
  0x13   : > { %v623_v5 = vunpack.c.l.bf16 %v622_v2  ;;  %v624_v7 = vunpack.c.h.bf16 %v622_v2  ;;  %v627_v11 = vunpack.c.l.bf16 %v685_v8  ;;  %v628_v13 = vunpack.c.h.bf16 %v685_v8  ;;  %v695_v40 = vld [vmem:[%s787_s16 + $0x58] sm:$0xff]   ;;  %v696_v8 = vld [vmem:[%s787_s16 + $0x60] sm:$0xff]  }
  0x14   : > { %v269_v14 = vmul.f32 %v655_v4, %v792_v0  ;;  %v270_v16 = vmul.f32 %v656_v6, %v792_v0  ;;  %v271_v19 = vmul.f32 %v659_v10, %v792_v0  ;;  %v272_v21 = vmul.f32 %v660_v12, %v792_v0  ;;  %v687_v44 = vld [vmem:[%s787_s16 + $0x18] sm:$0xff]   ;;  %v688_v10 = vld [vmem:[%s787_s16 + $0x20] sm:$0xff]  }
  0x15   : > { %v253_v15 = vmul.f32 %v623_v5, %v792_v0  ;;  %v254_v17 = vmul.f32 %v624_v7, %v792_v0  ;;  %v255_v20 = vmul.f32 %v627_v11, %v792_v0  ;;  %v256_v29 = vmul.f32 %v628_v13, %v792_v0 }
  0x16   : > { %v305_v22 = vadd.f32 %v801_v9, %v269_v14  ;;  %v306_v24 = vadd.f32 %v801_v9, %v270_v16  ;;  %v307_v26 = vadd.f32 %v801_v9, %v271_v19  ;;  %v308_v28 = vadd.f32 %v801_v9, %v272_v21 }
  0x17   : > { %v289_v23 = vadd.f32 %v801_v9, %v253_v15  ;;  %v290_v25 = vadd.f32 %v801_v9, %v254_v17  ;;  %v291_v27 = vadd.f32 %v801_v9, %v255_v20  ;;  %v292_v39 = vadd.f32 %v801_v9, %v256_v29 }
  0x18   : > { %vm338_vm0 = vcmp.ge.f32.partialorder %v305_v22, 0.0  ;;  %v374_v30 = vmul.f32 %v810_v18, %v305_v22  ;;  %vm339_vm2 = vcmp.ge.f32.partialorder %v306_v24, 0.0  ;;  %v375_v32 = vmul.f32 %v810_v18, %v306_v24 }
  0x19   : > { %vm322_vm1 = vcmp.ge.f32.partialorder %v289_v23, 0.0  ;;  %v358_v31 = vmul.f32 %v810_v18, %v289_v23  ;;  %vm323_vm3 = vcmp.ge.f32.partialorder %v290_v25, 0.0  ;;  %v359_v33 = vmul.f32 %v810_v18, %v290_v25 }
  0x1a   : > { %v406_v34 = vsel %vm338_vm0, %v305_v22, %v374_v30  ;;  %vm340_vm4 = vcmp.ge.f32.partialorder %v307_v26, 0.0  ;;  %v376_v36 = vmul.f32 %v810_v18, %v307_v26  ;;  %v407_v41 = vsel %vm339_vm2, %v306_v24, %v375_v32 }
  0x1b   : > { %v390_v35 = vsel %vm322_vm1, %v289_v23, %v358_v31  ;;  %454 = vxpose.xlu1.b32.start [1/16] %v406_v34, 128  ;;  %v391_v42 = vsel %vm323_vm3, %v290_v25, %v359_v33  ;;  %vm324_vm5 = vcmp.ge.f32.partialorder %v291_v27, 0.0  ;;  %v360_v43 = vmul.f32 %v810_v18, %v291_v27  ;;  %v689_v33 = vld [vmem:[%s787_s16 + $0x28] sm:$0xff]  }
  0x1c   : > { %422 = vxpose.xlu0.b32.start [1/16] %v390_v35, 128  ;;  %v408_v45 = vsel %vm340_vm4, %v307_v26, %v376_v36  ;;  %vm341_vm6 = vcmp.ge.f32.partialorder %v308_v28, 0.0  ;;  %v663_v46 = vunpack.c.l.bf16 %v694_v37  ;;  %v631_v47 = vunpack.c.l.bf16 %v686_v38 }
  0x1d   : > { %v377_v48 = vmul.f32 %v810_v18, %v308_v28  ;;  %v664_v49 = vunpack.c.h.bf16 %v694_v37  ;;  %v632_v50 = vunpack.c.h.bf16 %v686_v38  ;;  %v667_v51 = vunpack.c.l.bf16 %v695_v40 }
  0x1e   : > { %v361_v52 = vmul.f32 %v810_v18, %v292_v39  ;;  %v273_v53 = vmul.f32 %v663_v46, %v792_v0  ;;  %v257_v54 = vmul.f32 %v631_v47, %v792_v0  ;;  %v635_v55 = vunpack.c.l.bf16 %v687_v44 }
  0x1f   : > { %455 = vxpose.xlu1.b32.cont [2/16] %v407_v41, 128  ;;  %v392_v56 = vsel %vm324_vm5, %v291_v27, %v360_v43  ;;  %vm325_vm7 = vcmp.ge.f32.partialorder %v292_v39, 0.0  ;;  %v274_v57 = vmul.f32 %v664_v49, %v792_v0  ;;  %v258_v58 = vmul.f32 %v632_v50, %v792_v0 }
  0x20   : > { %423 = vxpose.xlu0.b32.cont [2/16] %v391_v42, 128  ;;  %v309_v59 = vadd.f32 %v801_v9, %v273_v53  ;;  %v293_v60 = vadd.f32 %v801_v9, %v257_v54  ;;  %v275_v61 = vmul.f32 %v667_v51, %v792_v0  ;;  %v259_v62 = vmul.f32 %v635_v55, %v792_v0  ;;  %v698_v54 = vld [vmem:[%s787_s16 + $0x70] sm:$0xff]  }
  0x21   : > { %v668_v63 = vunpack.c.h.bf16 %v695_v40  ;;  %v409_v1 = vsel %vm341_vm6, %v308_v28, %v377_v48  ;;  %v393_v2 = vsel %vm325_vm7, %v292_v39, %v361_v52  ;;  %v636_v3 = vunpack.c.h.bf16 %v687_v44  ;;  %v697_v28 = vld [vmem:[%s787_s16 + $0x68] sm:$0xff]   ;;  %v690_v55 = vld [vmem:[%s787_s16 + $0x30] sm:$0xff]  }
  0x22   : > { %v378_v4 = vmul.f32 %v810_v18, %v309_v59  ;;  %v362_v5 = vmul.f32 %v810_v18, %v293_v60  ;;  %v310_v6 = vadd.f32 %v801_v9, %v274_v57  ;;  %v294_v7 = vadd.f32 %v801_v9, %v258_v58 }
  0x23   : > { %456 = vxpose.xlu1.b32.cont [3/16] %v408_v45, 128  ;;  %vm342_vm8 = vcmp.ge.f32.partialorder %v309_v59, 0.0  ;;  %vm326_vm9 = vcmp.ge.f32.partialorder %v293_v60, 0.0  ;;  %v311_v11 = vadd.f32 %v801_v9, %v275_v61  ;;  %v295_v12 = vadd.f32 %v801_v9, %v259_v62 }
  0x24   : > { %424 = vxpose.xlu0.b32.cont [3/16] %v392_v56, 128  ;;  %v276_v13 = vmul.f32 %v668_v63, %v792_v0  ;;  %v260_v14 = vmul.f32 %v636_v3, %v792_v0  ;;  %v671_v15 = vunpack.c.l.bf16 %v696_v8  ;;  %v639_v16 = vunpack.c.l.bf16 %v688_v10 }
  0x25   : > { %v410_v17 = vsel %vm342_vm8, %v309_v59, %v378_v4  ;;  %v394_v19 = vsel %vm326_vm9, %v293_v60, %v362_v5  ;;  %v379_v20 = vmul.f32 %v810_v18, %v310_v6  ;;  %v363_v21 = vmul.f32 %v810_v18, %v294_v7 }
  0x26   : > { %vm343_vm10 = vcmp.ge.f32.partialorder %v310_v6, 0.0  ;;  %vm327_vm11 = vcmp.ge.f32.partialorder %v294_v7, 0.0  ;;  %vm344_vm12 = vcmp.ge.f32.partialorder %v311_v11, 0.0  ;;  %v380_v22 = vmul.f32 %v810_v18, %v311_v11 }
  0x27   : > { %457 = vxpose.xlu1.b32.cont [4/16] %v409_v1, 128  ;;  %v364_v23 = vmul.f32 %v810_v18, %v295_v12  ;;  %v312_v24 = vadd.f32 %v801_v9, %v276_v13  ;;  %vm328_vm13 = vcmp.ge.f32.partialorder %v295_v12, 0.0  ;;  %v296_v25 = vadd.f32 %v801_v9, %v260_v14 }
  0x28   : > { %425 = vxpose.xlu0.b32.cont [4/16] %v393_v2, 128  ;;  %v277_v26 = vmul.f32 %v671_v15, %v792_v0  ;;  %v261_v27 = vmul.f32 %v639_v16, %v792_v0  ;;  %v411_v29 = vsel %vm343_vm10, %v310_v6, %v379_v20  ;;  %v395_v30 = vsel %vm327_vm11, %v294_v7, %v363_v21  ;;  %v691_v15 = vld [vmem:[%s787_s16 + $0x38] sm:$0xff]  }
  0x29   : > { %v672_v31 = vunpack.c.h.bf16 %v696_v8  ;;  %v640_v32 = vunpack.c.h.bf16 %v688_v10  ;;  %v412_v34 = vsel %vm344_vm12, %v311_v11, %v380_v22  ;;  %v396_v35 = vsel %vm328_vm13, %v295_v12, %v364_v23  ;;  %v699_v10 = vld [vmem:[%s787_s16 + $0x78] sm:$0xff]  }
  0x2a   : > { %v381_v36 = vmul.f32 %v810_v18, %v312_v24  ;;  %v675_v37 = vunpack.c.l.bf16 %v697_v28  ;;  %vm345_vm14 = vcmp.ge.f32.partialorder %v312_v24, 0.0  ;;  %v365_v38 = vmul.f32 %v810_v18, %v296_v25 }
  0x2b   : > { %458 = vxpose.xlu1.b32.cont [5/16] %v410_v17, 128  ;;  %v313_v39 = vadd.f32 %v801_v9, %v277_v26  ;;  %v297_v40 = vadd.f32 %v801_v9, %v261_v27  ;;  %vm329_vm15 = vcmp.ge.f32.partialorder %v296_v25, 0.0  ;;  %v278_v41 = vmul.f32 %v672_v31, %v792_v0 }
  0x2c   : > { %426 = vxpose.xlu0.b32.cont [5/16] %v394_v19, 128  ;;  %v262_v42 = vmul.f32 %v640_v32, %v792_v0  ;;  %v643_v43 = vunpack.c.l.bf16 %v689_v33  ;;  %v413_v44 = vsel %vm345_vm14, %v312_v24, %v381_v36  ;;  %v279_v45 = vmul.f32 %v675_v37, %v792_v0 }
  0x2d   : > { %v676_v46 = vunpack.c.h.bf16 %v697_v28  ;;  %v644_v47 = vunpack.c.h.bf16 %v689_v33  ;;  %v397_v48 = vsel %vm329_vm15, %v296_v25, %v365_v38  ;;  %vm346_vm0 = vcmp.ge.f32.partialorder %v313_v39, 0.0 }
  0x2e   : > { %v382_v49 = vmul.f32 %v810_v18, %v313_v39  ;;  %v366_v50 = vmul.f32 %v810_v18, %v297_v40  ;;  %vm330_vm1 = vcmp.ge.f32.partialorder %v297_v40, 0.0  ;;  %v314_v51 = vadd.f32 %v801_v9, %v278_v41 }
  0x2f   : > { %459 = vxpose.xlu1.b32.cont [6/16] %v411_v29, 128  ;;  %v298_v52 = vadd.f32 %v801_v9, %v262_v42  ;;  %v263_v53 = vmul.f32 %v643_v43, %v792_v0  ;;  %v280_v56 = vmul.f32 %v676_v46, %v792_v0  ;;  %v264_v57 = vmul.f32 %v644_v47, %v792_v0 }
  0x30   : > { %427 = vxpose.xlu0.b32.cont [6/16] %v395_v30, 128  ;;  %v414_v58 = vsel %vm346_vm0, %v313_v39, %v382_v49  ;;  %v398_v59 = vsel %vm330_vm1, %v297_v40, %v366_v50  ;;  %v315_v60 = vadd.f32 %v801_v9, %v279_v45  ;;  %v679_v61 = vunpack.c.l.bf16 %v698_v54 }
  0x31   : > { %v383_v62 = vmul.f32 %v810_v18, %v314_v51  ;;  %v367_v63 = vmul.f32 %v810_v18, %v298_v52  ;;  %v299_v1 = vadd.f32 %v801_v9, %v263_v53  ;;  %v647_v2 = vunpack.c.l.bf16 %v690_v55 }
  0x32   : > { %vm347_vm2 = vcmp.ge.f32.partialorder %v314_v51, 0.0  ;;  %vm331_vm3 = vcmp.ge.f32.partialorder %v298_v52, 0.0  ;;  %v316_v3 = vadd.f32 %v801_v9, %v280_v56  ;;  %v300_v4 = vadd.f32 %v801_v9, %v264_v57 }
  0x33   : > { %460 = vxpose.xlu1.b32.cont [7/16] %v412_v34, 128  ;;  %v384_v5 = vmul.f32 %v810_v18, %v315_v60  ;;  %v281_v6 = vmul.f32 %v679_v61, %v792_v0  ;;  %v680_v7 = vunpack.c.h.bf16 %v698_v54  ;;  %v648_v8 = vunpack.c.h.bf16 %v690_v55 }
  0x34   : > { %428 = vxpose.xlu0.b32.cont [7/16] %v396_v35, 128  ;;  %v415_v11 = vsel %vm347_vm2, %v314_v51, %v383_v62  ;;  %v399_v12 = vsel %vm331_vm3, %v298_v52, %v367_v63  ;;  %v368_v13 = vmul.f32 %v810_v18, %v299_v1  ;;  %v265_v14 = vmul.f32 %v647_v2, %v792_v0 }
  0x35   : > { %vm348_vm4 = vcmp.ge.f32.partialorder %v315_v60, 0.0  ;;  %vm332_vm5 = vcmp.ge.f32.partialorder %v299_v1, 0.0  ;;  %vm349_vm6 = vcmp.ge.f32.partialorder %v316_v3, 0.0  ;;  %v385_v16 = vmul.f32 %v810_v18, %v316_v3 }
  0x36   : > { %v369_v17 = vmul.f32 %v810_v18, %v300_v4  ;;  %v683_v19 = vunpack.c.l.bf16 %v699_v10  ;;  %vm333_vm7 = vcmp.ge.f32.partialorder %v300_v4, 0.0  ;;  %v317_v20 = vadd.f32 %v801_v9, %v281_v6 }
  0x37   : > { %461 = vxpose.xlu1.b32.cont [8/16] %v413_v44, 128  ;;  %v282_v21 = vmul.f32 %v680_v7, %v792_v0  ;;  %v266_v22 = vmul.f32 %v648_v8, %v792_v0  ;;  %v416_v23 = vsel %vm348_vm4, %v315_v60, %v384_v5  ;;  %v400_v24 = vsel %vm332_vm5, %v299_v1, %v368_v13 }
  0x38   : > { %429 = vxpose.xlu0.b32.cont [8/16] %v397_v48, 128  ;;  %v301_v25 = vadd.f32 %v801_v9, %v265_v14  ;;  %v651_v26 = vunpack.c.l.bf16 %v691_v15  ;;  %v417_v27 = vsel %vm349_vm6, %v316_v3, %v385_v16  ;;  %v401_v28 = vsel %vm333_vm7, %v300_v4, %v369_v17 }
  0x39   : > { %v283_v29 = vmul.f32 %v683_v19, %v792_v0  ;;  %vm350_vm8 = vcmp.ge.f32.partialorder %v317_v20, 0.0  ;;  %v386_v30 = vmul.f32 %v810_v18, %v317_v20  ;;  %v318_v31 = vadd.f32 %v801_v9, %v282_v21 }
  0x3a   : > { %v302_v32 = vadd.f32 %v801_v9, %v266_v22  ;;  %v370_v33 = vmul.f32 %v810_v18, %v301_v25  ;;  %v267_v34 = vmul.f32 %v651_v26, %v792_v0  ;;  %v684_v35 = vunpack.c.h.bf16 %v699_v10 }
  0x3b   : > { %462 = vxpose.xlu1.b32.cont [9/16] %v414_v58, 128  ;;  %v652_v36 = vunpack.c.h.bf16 %v691_v15  ;;  %vm334_vm9 = vcmp.ge.f32.partialorder %v301_v25, 0.0  ;;  %v319_v37 = vadd.f32 %v801_v9, %v283_v29  ;;  %v418_v38 = vsel %vm350_vm8, %v317_v20, %v386_v30 }
  0x3c   : > { %430 = vxpose.xlu0.b32.cont [9/16] %v398_v59, 128  ;;  %vm351_vm10 = vcmp.ge.f32.partialorder %v318_v31, 0.0  ;;  %v387_v39 = vmul.f32 %v810_v18, %v318_v31  ;;  %v371_v40 = vmul.f32 %v810_v18, %v302_v32  ;;  %v402_v41 = vsel %vm334_vm9, %v301_v25, %v370_v33 }
  0x3d   : > { %v303_v42 = vadd.f32 %v801_v9, %v267_v34  ;;  %v284_v43 = vmul.f32 %v684_v35, %v792_v0  ;;  %v268_v44 = vmul.f32 %v652_v36, %v792_v0  ;;  %vm335_vm11 = vcmp.ge.f32.partialorder %v302_v32, 0.0 }
  0x3e   : > { %v419_v45 = vsel %vm351_vm10, %v318_v31, %v387_v39  ;;  %v388_v46 = vmul.f32 %v810_v18, %v319_v37  ;;  %v403_v47 = vsel %vm335_vm11, %v302_v32, %v371_v40  ;;  %vm352_vm12 = vcmp.ge.f32.partialorder %v319_v37, 0.0 }
  0x3f   : > { %463 = vxpose.xlu1.b32.cont [10/16] %v415_v11, 128  ;;  %v372_v48 = vmul.f32 %v810_v18, %v303_v42  ;;  %v320_v49 = vadd.f32 %v801_v9, %v284_v43  ;;  %v304_v50 = vadd.f32 %v801_v9, %v268_v44  ;;  %vm336_vm13 = vcmp.ge.f32.partialorder %v303_v42, 0.0 }
  0x40   : > { %431 = vxpose.xlu0.b32.cont [10/16] %v399_v12, 128  ;;  %v420_v51 = vsel %vm352_vm12, %v319_v37, %v388_v46 }
  0x41   : > { %v404_v0 = vsel %vm336_vm13, %v303_v42, %v372_v48  ;;  %v389_v52 = vmul.f32 %v810_v18, %v320_v49  ;;  %v373_v53 = vmul.f32 %v810_v18, %v304_v50  ;;  %vm353_vm14 = vcmp.ge.f32.partialorder %v320_v49, 0.0 }
  0x42   : > { %vm337_vm15 = vcmp.ge.f32.partialorder %v304_v50, 0.0 }
  0x43   : > { %464 = vxpose.xlu1.b32.cont [11/16] %v416_v23, 128  ;;  %v421_v54 = vsel %vm353_vm14, %v320_v49, %v389_v52  ;;  %v405_v55 = vsel %vm337_vm15, %v304_v50, %v373_v53 }
  0x44   : > { %432 = vxpose.xlu0.b32.cont [11/16] %v400_v24, 128 }
  0x47   : > { %465 = vxpose.xlu1.b32.cont [12/16] %v417_v27, 128 }
  0x48   : > { %433 = vxpose.xlu0.b32.cont [12/16] %v401_v28, 128 }
  0x4b   : > { %466 = vxpose.xlu1.b32.cont [13/16] %v418_v38, 128 }
  0x4c   : > { %434 = vxpose.xlu0.b32.cont [13/16] %v402_v41, 128 }
  0x4f   : > { %467 = vxpose.xlu1.b32.cont [14/16] %v419_v45, 128 }
  0x50   : > { %435 = vxpose.xlu0.b32.cont [14/16] %v403_v47, 128 }
  0x53   : > { %468 = vxpose.xlu1.b32.cont [15/16] %v420_v51, 128 }
  0x54   : > { %436 = vxpose.xlu0.b32.cont [15/16] %v404_v0, 128 }
  0x57   : > { %469 = vxpose.xlu1.b32.end [16/16] %v421_v54, 128 }
  0x58   : > { %437 = vxpose.xlu0.b32.end [16/16] %v405_v55, 128 }
  0x9b   : > { %v470_v9 = vpop.trf.xlu1 }
  0x9c   : > { %v438_v18 = vpop.trf.xlu0  ;;  %487 = vst [vmem:[%s923_s26 + $0x8] sm:$0xff] %v470_v9 }
  0x9d   : > { %486 = vst [vmem:[%s923_s26] sm:$0xff] %v438_v18 }
  0x9f   : > { %v471_v56 = vpop.trf.xlu1 }
  0xa0   : > { %v439_v57 = vpop.trf.xlu0  ;;  %489 = vst [vmem:[%s923_s26 + $0x18] sm:$0xff] %v471_v56 }
  0xa1   : > { %488 = vst [vmem:[%s923_s26 + $0x10] sm:$0xff] %v439_v57 }
  0xa3   : > { %v472_v58 = vpop.trf.xlu1 }
  0xa4   : > { %v440_v59 = vpop.trf.xlu0  ;;  %491 = vst [vmem:[%s923_s26 + $0x28] sm:$0xff] %v472_v58 }
  0xa5   : > { %490 = vst [vmem:[%s923_s26 + $0x20] sm:$0xff] %v440_v59 }
  0xa7   : > { %v473_v60 = vpop.trf.xlu1 }
  0xa8   : > { %v441_v61 = vpop.trf.xlu0  ;;  %493 = vst [vmem:[%s923_s26 + $0x38] sm:$0xff] %v473_v60 }
  0xa9   : > { %492 = vst [vmem:[%s923_s26 + $0x30] sm:$0xff] %v441_v61 }
  0xab   : > { %v474_v62 = vpop.trf.xlu1 }
  0xac   : > { %v442_v63 = vpop.trf.xlu0  ;;  %495 = vst [vmem:[%s923_s26 + $0x48] sm:$0xff] %v474_v62 }
  0xad   : > { %494 = vst [vmem:[%s923_s26 + $0x40] sm:$0xff] %v442_v63 }
  0xaf   : > { %v475_v1 = vpop.trf.xlu1 }
  0xb0   : > { %v443_v2 = vpop.trf.xlu0  ;;  %497 = vst [vmem:[%s923_s26 + $0x58] sm:$0xff] %v475_v1 }
  0xb1   : > { %496 = vst [vmem:[%s923_s26 + $0x50] sm:$0xff] %v443_v2 }
  0xb3   : > { %v476_v3 = vpop.trf.xlu1 }
  0xb4   : > { %v444_v4 = vpop.trf.xlu0  ;;  %499 = vst [vmem:[%s923_s26 + $0x68] sm:$0xff] %v476_v3 }
  0xb5   : > { %498 = vst [vmem:[%s923_s26 + $0x60] sm:$0xff] %v444_v4 }
  0xb7   : > { %v477_v5 = vpop.trf.xlu1 }
  0xb8   : > { %v445_v6 = vpop.trf.xlu0  ;;  %501 = vst [vmem:[%s923_s26 + $0x78] sm:$0xff] %v477_v5 }
  0xb9   : > { %500 = vst [vmem:[%s923_s26 + $0x70] sm:$0xff] %v445_v6 }
  0xbb   : > { %v478_v7 = vpop.trf.xlu1 }
  0xbc   : > { %v446_v8 = vpop.trf.xlu0  ;;  %503 = vst [vmem:[%s923_s26 + $0x88] sm:$0xff] %v478_v7 }
  0xbd   : > { %502 = vst [vmem:[%s923_s26 + $0x80] sm:$0xff] %v446_v8 }
  0xbf   : > { %v479_v10 = vpop.trf.xlu1 }
  0xc0   : > { %v447_v11 = vpop.trf.xlu0  ;;  %505 = vst [vmem:[%s923_s26 + $0x98] sm:$0xff] %v479_v10 }
  0xc1   : > { %504 = vst [vmem:[%s923_s26 + $0x90] sm:$0xff] %v447_v11 }
  0xc3   : > { %v480_v12 = vpop.trf.xlu1 }
  0xc4   : > { %v448_v13 = vpop.trf.xlu0  ;;  %507 = vst [vmem:[%s923_s26 + $0xa8] sm:$0xff] %v480_v12 }
  0xc5   : > { %506 = vst [vmem:[%s923_s26 + $0xa0] sm:$0xff] %v448_v13 }
  0xc7   : > { %v481_v14 = vpop.trf.xlu1 }
  0xc8   : > { %v449_v15 = vpop.trf.xlu0  ;;  %509 = vst [vmem:[%s923_s26 + $0xb8] sm:$0xff] %v481_v14 }
  0xc9   : > { %508 = vst [vmem:[%s923_s26 + $0xb0] sm:$0xff] %v449_v15 }
  0xcb   : > { %v482_v16 = vpop.trf.xlu1 }
  0xcc   : > { %v450_v17 = vpop.trf.xlu0  ;;  %511 = vst [vmem:[%s923_s26 + $0xc8] sm:$0xff] %v482_v16 }
  0xcd   : > { %510 = vst [vmem:[%s923_s26 + $0xc0] sm:$0xff] %v450_v17 }
  0xcf   : > { %v483_v19 = vpop.trf.xlu1 }
  0xd0   : > { %v451_v20 = vpop.trf.xlu0  ;;  %513 = vst [vmem:[%s923_s26 + $0xd8] sm:$0xff] %v483_v19 }
  0xd1   : > { %512 = vst [vmem:[%s923_s26 + $0xd0] sm:$0xff] %v451_v20 }
  0xd3   : > { %v484_v21 = vpop.trf.xlu1 }
  0xd4   : > { %v452_v22 = vpop.trf.xlu0  ;;  %515 = vst [vmem:[%s923_s26 + $0xe8] sm:$0xff] %v484_v21 }
  0xd5   : > { %514 = vst [vmem:[%s923_s26 + $0xe0] sm:$0xff] %v452_v22 }
  0xd7   : > { %v485_v23 = vpop.trf.xlu1 }
  0xd8   : > { %v453_v24 = vpop.trf.xlu0  ;;  %517 = vst [vmem:[%s923_s26 + $0xf8] sm:$0xff] %v485_v23 }
  0xd9   : > { %516 = vst [vmem:[%s923_s26 + $0xf0] sm:$0xff] %v453_v24 }
  0xda PF: > { %s12_s11 = sadd.s32 1, %s746_s11   ;;  %s969_s9 = smov %s742_s10 }
  0xdb   : > { %p9_p5 = scmp.ge.s32.totalorder %s12_s11, 4   ;;  %s970_s10 = smov %s972_s12 }
  0xdd   :  { %11 = sbr.rel (!%p9_p5) target bundleno = 2 (0x2), region = 58 }

// kernel: _conv_block_forward.2
= control target key start
LH: loop header
LB: loop body
LE: loop exit
PB: predicated region body
PF: predicated region fallthrough
CT: control target
= control target key end

     0   :  { %s1552_s12 = smov 0   ;;  %s1554_s13 = smov 0   ;;  %s1740_s0 = inlined_call_operand.vmem [shape: bf16[2,256,128], index: 0, kind: input, shape index: {}]   ;;  %s1741_s1 = inlined_call_operand.vmem [shape: bf16[128,128], index: 1, kind: input, shape index: {}]   ;;  %s1742_s2 = inlined_call_operand.vmem [shape: bf16[2,256,128], index: 2, kind: output, shape index: {0}]   ;;  %s1743_s3 = inlined_call_operand.vmem [shape: f32[2,1,2,128], index: 3, kind: output, shape index: {1}]  }
   0x1   :  { %s1556_s14 = smov 0  }
   0x2 LB: > { %s33_s15 = sadd.s32 1, %s1526_s13  ;;  %p1179_p0 = scmp.ge.s32.totalorder %s1530_s14, 1  ;;  %s1530_s14 = sphi %s1556_s14, %s14_s14   ;;  %s1526_s13 = sphi %s1554_s13, %s1745_s13   ;;  %s1522_s12 = sphi %s1552_s12, %s1744_s12  }
   0x3   : > { %p35_p1 = scmp.ge.s32.totalorder %s33_s15, 2  ;;  %p175_p2 = scmp.lt.s32.totalorder %s1530_s14, 3 }
   0x5   : > { %s1747_s15 = smov (%p35_p1, %s33_s15), 0  ;;  %p176_p3 = pnand %p1179_p0, %p175_p2 }
   0x6   : > { %v1484_v0 = vld [vmem:[%s1741_s1] sm:$0xff] (!%p176_p3)   ;;  %p218_p4 = scmp.lt.s32.totalorder (!%p176_p3), %s1522_s12, 1  ;;  %v1485_v1 = vld [vmem:[%s1741_s1 + $0x8] sm:$0xff] (!%p176_p3)   ;;  %v1486_v2 = vld [vmem:[%s1741_s1 + $0x10] sm:$0xff] (!%p176_p3)   ;;  %vm1038_vm0 = vcmask (!%p176_p3), 1040384  }
   0x7   : > { %179 = sbr.rel (%p176_p3) target bundleno = 332 (0x14c), region = 28  ;;  %1396 = vmatprep.subr.bf16.mxu0 (!%p176_p3), %v1484_v0  ;;  %1444 = vmatprep.subr.bf16.mxu1 (!%p176_p3), %v1484_v0  ;;  %v1487_v3 = vld [vmem:[%s1741_s1 + $0x18] sm:$0xff] (!%p176_p3)   ;;  %v1488_v5 = vld [vmem:[%s1741_s1 + $0x20] sm:$0xff] (!%p176_p3)   ;;  %v1489_v6 = vld [vmem:[%s1741_s1 + $0x28] sm:$0xff] (!%p176_p3)  }
   0x8   : > { %1397 = vmatpush3.bf16.msra.mxu0 (!%p176_p3), %v1484_v0  ;;  %1452 = vmatpush3.bf16.msra.mxu1 (!%p176_p3), %v1484_v0  ;;  %v1490_v8 = vld [vmem:[%s1741_s1 + $0x30] sm:$0xff] (!%p176_p3)   ;;  %v1491_v9 = vld [vmem:[%s1741_s1 + $0x38] sm:$0xff] (!%p176_p3)  }
   0x9   : > { %1398 = vmatprep.subr.bf16.mxu0 (!%p176_p3), %v1485_v1  ;;  %1445 = vmatprep.subr.bf16.mxu1 (!%p176_p3), %v1485_v1 }
   0xc   : > { %1399 = vmatpush3.bf16.msra.mxu0 (!%p176_p3), %v1485_v1  ;;  %1453 = vmatpush3.bf16.msra.mxu1 (!%p176_p3), %v1485_v1 }
   0xd   : > { %1400 = vmatprep.subr.bf16.mxu0 (!%p176_p3), %v1486_v2  ;;  %1446 = vmatprep.subr.bf16.mxu1 (!%p176_p3), %v1486_v2 }
   0xe   : > { %s1749_s12 = smov (!%p218_p4, %s1522_s12), 1 }
   0xf   : > { %s1243_s22 = sshll.u32 %s1749_s12, 7  ;;  %s1184_s16 = sshll.u32 %s1749_s12, 1 }
  0x10   : > { %s1587_s25 = scalar_lea.vmem %s1740_s0, %s1243_s22  ;;  %1401 = vmatpush3.bf16.msra.mxu0 %v1486_v2  ;;  %1454 = vmatpush3.bf16.msra.mxu1 %v1486_v2  ;;  %s1629_s11 = scalar_lea.vmem %s1742_s2, %s1243_s22 }
  0x11   : > { %v1492_v4 = vld [vmem:[%s1587_s25] sm:$0xff]   ;;  %1402 = vmatprep.subr.bf16.mxu0 %v1487_v3  ;;  %1447 = vmatprep.subr.bf16.mxu1 %v1487_v3  ;;  %v1493_v10 = vld [vmem:[%s1587_s25 + $0x8] sm:$0xff]   ;;  %v1494_v12 = vld [vmem:[%s1587_s25 + $0x10] sm:$0xff]   ;;  %s246_s19 = scalar_lea.vmem %s1743_s3, %s1184_s16 }
  0x12   : > { %1412 = vmatprep.mubr.bf16.mxu0 %v1492_v4  ;;  %v1500_v7 = vld [vmem:[%s1587_s25 + $0x40] sm:$0xff]   ;;  %v1501_v11 = vld [vmem:[%s1587_s25 + $0x48] sm:$0xff]   ;;  %v1502_v13 = vld [vmem:[%s1587_s25 + $0x50] sm:$0xff]  }
  0x13   : > { %1428 = vmatprep.mubr.bf16.mxu1 %v1500_v7  ;;  %v1495_v14 = vld [vmem:[%s1587_s25 + $0x18] sm:$0xff]   ;;  %v1496_v16 = vld [vmem:[%s1587_s25 + $0x20] sm:$0xff]   ;;  %v1497_v18 = vld [vmem:[%s1587_s25 + $0x28] sm:$0xff]  }
  0x14   : > { %1403 = vmatpush3.bf16.msra.mxu0 %v1487_v3  ;;  %1455 = vmatpush3.bf16.msra.mxu1 %v1487_v3  ;;  %v1503_v15 = vld [vmem:[%s1587_s25 + $0x58] sm:$0xff]   ;;  %v1504_v17 = vld [vmem:[%s1587_s25 + $0x60] sm:$0xff]   ;;  %v1505_v19 = vld [vmem:[%s1587_s25 + $0x68] sm:$0xff]  }
  0x15   : > { %1404 = vmatprep.subr.bf16.mxu0 %v1488_v5  ;;  %1448 = vmatprep.subr.bf16.mxu1 %v1488_v5  ;;  %v1498_v20 = vld [vmem:[%s1587_s25 + $0x30] sm:$0xff]   ;;  %v1499_v22 = vld [vmem:[%s1587_s25 + $0x38] sm:$0xff]  }
  0x16   : > { %v1506_v21 = vld [vmem:[%s1587_s25 + $0x70] sm:$0xff]   ;;  %v1507_v23 = vld [vmem:[%s1587_s25 + $0x78] sm:$0xff]  }
  0x18   : > { %1405 = vmatpush3.bf16.msra.mxu0 %v1488_v5  ;;  %1456 = vmatpush3.bf16.msra.mxu1 %v1488_v5 }
  0x19   : > { %1406 = vmatprep.subr.bf16.mxu0 %v1489_v6  ;;  %1449 = vmatprep.subr.bf16.mxu1 %v1489_v6 }
  0x1c   : > { %1407 = vmatpush3.bf16.msra.mxu0 %v1489_v6  ;;  %1457 = vmatpush3.bf16.msra.mxu1 %v1489_v6 }
  0x1d   : > { %1408 = vmatprep.subr.bf16.mxu0 %v1490_v8  ;;  %1450 = vmatprep.subr.bf16.mxu1 %v1490_v8 }
  0x20   : > { %1409 = vmatpush3.bf16.msra.mxu0 %v1490_v8  ;;  %1458 = vmatpush3.bf16.msra.mxu1 %v1490_v8 }
  0x21   : > { %1410 = vmatprep.subr.bf16.mxu0 %v1491_v9  ;;  %1451 = vmatprep.subr.bf16.mxu1 %v1491_v9 }
  0x24   : > { %1411 = vmatpush3.bf16.msra.mxu0 %v1491_v9  ;;  %1459 = vmatpush3.bf16.msra.mxu1 %v1491_v9 }
  0x27   : > { %1413 = vmatmul.mubr.bf16.vlgmr.msra.gmra.mrb[0].mxu0 %v1493_v10  ;;  %1429 = vmatmul.mubr.bf16.vlgmr.msra.gmra.mrb[0].mxu1 %v1501_v11 }
  0x28   : > { %1416 = vmatprep.mubr.bf16.mxu0 %v1494_v12  ;;  %1432 = vmatprep.mubr.bf16.mxu1 %v1502_v13 }
  0x2f   : > { %1417 = vmatmul.mubr.bf16.gmra.mrb[4].mxu0 %v1495_v14  ;;  %1433 = vmatmul.mubr.bf16.gmra.mrb[4].mxu1 %v1503_v15 }
  0x30   : > { %1420 = vmatprep.mubr.bf16.mxu0 %v1496_v16  ;;  %1436 = vmatprep.mubr.bf16.mxu1 %v1504_v17 }
  0x37   : > { %1421 = vmatmul.mubr.bf16.gmra.mrb[8].mxu0 %v1497_v18  ;;  %1437 = vmatmul.mubr.bf16.gmra.mrb[8].mxu1 %v1505_v19 }
  0x38   : > { %1424 = vmatprep.mubr.bf16.mxu0 %v1498_v20  ;;  %1440 = vmatprep.mubr.bf16.mxu1 %v1506_v21 }
  0x3f   : > { %1425 = vmatmul.mubr.bf16.gmra.mrb[12].mxu0 %v1499_v22  ;;  %1441 = vmatmul.mubr.bf16.gmra.mrb[12].mxu1 %v1507_v23 }
  0xfa   : > { %v1414_v24 = vpop.f32.mrb[0].mxu0  ;;  %v1620_v25 = vpop.f32.mrb[0].mxu1 }
  0xfb   : > { %v474_v26 = vpop.f32.mrb[1].mxu0  ;;  %v1622_v27 = vpop.f32.mrb[1].mxu1  ;;  %v971_v39 = vmul.f32 %v1414_v24, %v1414_v24 }
  0xfc   : > { %v1415_v28 = vpop.f32.mrb[2].mxu0  ;;  %v1631_v29 = vpop.f32.mrb[2].mxu1  ;;  %v969_v30 = vmul.f32 %v474_v26, %v474_v26 }
  0xfd   : > { %v1285_v31 = vpack.c.bf16 %v1415_v28, %v1414_v24  ;;  %v477_v32 = vpop.f32.mrb[3].mxu0  ;;  %v1325_v33 = vpack.c.bf16 %v1631_v29, %v1620_v25  ;;  %v1635_v34 = vpop.f32.mrb[3].mxu1  ;;  %v972_v42 = vmul.f32 %v1415_v28, %v1415_v28 }
  0xfe   : > { %v1280_v35 = vpack.c.bf16 %v477_v32, %v474_v26  ;;  %v932_v36 = vadd.f32 %v477_v32, %v474_v26  ;;  %v970_v37 = vmul.f32 %v477_v32, %v477_v32  ;;  %v1320_v38 = vpack.c.bf16 %v1635_v34, %v1622_v27 }
  0xff   : > { %1357 = vst [vmem:[%s1629_s11 + $0x8] sm:$0xff] %v1285_v31   ;;  %1365 = vst [vmem:[%s1629_s11 + $0x48] sm:$0xff] %v1325_v33  }
 0x100   : > { %1281 = vst [vmem:[%s1629_s11] sm:$0xff] %v1280_v35   ;;  %v933_v40 = vadd.f32 %v1414_v24, %v932_v36  ;;  %v1001_v41 = vadd.f32 %v970_v37, %v969_v30  ;;  %1364 = vst [vmem:[%s1629_s11 + $0x40] sm:$0xff] %v1320_v38  }
 0x102   : > { %v1002_v43 = vadd.f32 %v1001_v41, %v971_v39  ;;  %v1418_v44 = vpop.f32.mrb[4].mxu0  ;;  %v934_v45 = vadd.f32 %v1415_v28, %v933_v40  ;;  %v1643_v46 = vpop.f32.mrb[4].mxu1 }
 0x103   : > { %v490_v47 = vpop.f32.mrb[5].mxu0  ;;  %v1645_v48 = vpop.f32.mrb[5].mxu1  ;;  %v975_v63 = vmul.f32 %v1418_v44, %v1418_v44 }
 0x104   : > { %v935_v49 = vadd.f32 %v934_v45, %v490_v47  ;;  %v973_v50 = vmul.f32 %v490_v47, %v490_v47  ;;  %v1003_v51 = vadd.f32 %v1002_v43, %v972_v42  ;;  %v1419_v52 = vpop.f32.mrb[6].mxu0  ;;  %v1647_v53 = vpop.f32.mrb[6].mxu1 }
 0x105   : > { %v1295_v54 = vpack.c.bf16 %v1419_v52, %v1418_v44  ;;  %v493_v55 = vpop.f32.mrb[7].mxu0  ;;  %v1335_v56 = vpack.c.bf16 %v1647_v53, %v1643_v46  ;;  %v1651_v57 = vpop.f32.mrb[7].mxu1  ;;  %v976_v2 = vmul.f32 %v1419_v52, %v1419_v52 }
 0x106   : > { %v1004_v58 = vadd.f32 %v1003_v51, %v973_v50  ;;  %v1290_v59 = vpack.c.bf16 %v493_v55, %v490_v47  ;;  %v936_v60 = vadd.f32 %v935_v49, %v493_v55  ;;  %v974_v61 = vmul.f32 %v493_v55, %v493_v55 }
 0x107   : > { %1359 = vst [vmem:[%s1629_s11 + $0x18] sm:$0xff] %v1295_v54   ;;  %1367 = vst [vmem:[%s1629_s11 + $0x58] sm:$0xff] %v1335_v56   ;;  %v1330_v62 = vpack.c.bf16 %v1651_v57, %v1645_v48 }
 0x108   : > { %1358 = vst [vmem:[%s1629_s11 + $0x10] sm:$0xff] %v1290_v59   ;;  %v937_v0 = vadd.f32 %v1418_v44, %v936_v60  ;;  %v1005_v1 = vadd.f32 %v1004_v58, %v974_v61  ;;  %v985_v61 = vmul.f32 %v1622_v27, %v1622_v27 }
 0x109   : > { %1366 = vst [vmem:[%s1629_s11 + $0x50] sm:$0xff] %v1330_v62  }
 0x10a   : > { %v1006_v3 = vadd.f32 %v1005_v1, %v975_v63  ;;  %v1422_v4 = vpop.f32.mrb[8].mxu0  ;;  %v938_v5 = vadd.f32 %v1419_v52, %v937_v0  ;;  %v1659_v6 = vpop.f32.mrb[8].mxu1 }
 0x10b   : > { %v506_v7 = vpop.f32.mrb[9].mxu0  ;;  %v1661_v8 = vpop.f32.mrb[9].mxu1  ;;  %v979_v23 = vmul.f32 %v1422_v4, %v1422_v4 }
 0x10c   : > { %v939_v9 = vadd.f32 %v938_v5, %v506_v7  ;;  %v977_v10 = vmul.f32 %v506_v7, %v506_v7  ;;  %v1007_v11 = vadd.f32 %v1006_v3, %v976_v2  ;;  %v1423_v12 = vpop.f32.mrb[10].mxu0  ;;  %v1663_v13 = vpop.f32.mrb[10].mxu1  ;;  %v986_v2 = vmul.f32 %v1635_v34, %v1635_v34 }
 0x10d   : > { %v1305_v14 = vpack.c.bf16 %v1423_v12, %v1422_v4  ;;  %v509_v15 = vpop.f32.mrb[11].mxu0  ;;  %v1345_v16 = vpack.c.bf16 %v1663_v13, %v1659_v6  ;;  %v1667_v17 = vpop.f32.mrb[11].mxu1  ;;  %v980_v28 = vmul.f32 %v1423_v12, %v1423_v12  ;;  %v987_v3 = vmul.f32 %v1620_v25, %v1620_v25 }
 0x10e   : > { %v1008_v18 = vadd.f32 %v1007_v11, %v977_v10  ;;  %v1300_v19 = vpack.c.bf16 %v509_v15, %v506_v7  ;;  %v940_v20 = vadd.f32 %v939_v9, %v509_v15  ;;  %v978_v21 = vmul.f32 %v509_v15, %v509_v15 }
 0x10f   : > { %1361 = vst [vmem:[%s1629_s11 + $0x28] sm:$0xff] %v1305_v14   ;;  %1369 = vst [vmem:[%s1629_s11 + $0x68] sm:$0xff] %v1345_v16   ;;  %v1340_v22 = vpack.c.bf16 %v1667_v17, %v1661_v8  ;;  %v988_v7 = vmul.f32 %v1631_v29, %v1631_v29  ;;  %v990_v15 = vmul.f32 %v1651_v57, %v1651_v57 }
 0x110   : > { %1360 = vst [vmem:[%s1629_s11 + $0x20] sm:$0xff] %v1300_v19   ;;  %v941_v24 = vadd.f32 %v1422_v4, %v940_v20  ;;  %v1009_v26 = vadd.f32 %v1008_v18, %v978_v21 }
 0x111   : > { %1368 = vst [vmem:[%s1629_s11 + $0x60] sm:$0xff] %v1340_v22  }
 0x112   : > { %v1010_v30 = vadd.f32 %v1009_v26, %v979_v23  ;;  %v1426_v31 = vpop.f32.mrb[12].mxu0  ;;  %v942_v32 = vadd.f32 %v1423_v12, %v941_v24  ;;  %v1675_v33 = vpop.f32.mrb[12].mxu1  ;;  %v994_v24 = vmul.f32 %v1667_v17, %v1667_v17 }
 0x113   : > { %v522_v35 = vpop.f32.mrb[13].mxu0  ;;  %v586_v36 = vpop.f32.mrb[13].mxu1  ;;  %v983_v54 = vmul.f32 %v1426_v31, %v1426_v31 }
 0x114   : > { %v943_v37 = vadd.f32 %v942_v32, %v522_v35  ;;  %v981_v38 = vmul.f32 %v522_v35, %v522_v35  ;;  %v1011_v39 = vadd.f32 %v1010_v30, %v980_v28  ;;  %v1427_v40 = vpop.f32.mrb[14].mxu0  ;;  %v1677_v41 = vpop.f32.mrb[14].mxu1 }
 0x115   : > { %v1315_v42 = vpack.c.bf16 %v1427_v40, %v1426_v31  ;;  %v525_v43 = vpop.f32.mrb[15].mxu0  ;;  %v1355_v44 = vpack.c.bf16 %v1677_v41, %v1675_v33  ;;  %v589_v45 = vpop.f32.mrb[15].mxu1  ;;  %v984_v58 = vmul.f32 %v1427_v40, %v1427_v40 }
 0x116   : > { %v1012_v47 = vadd.f32 %v1011_v39, %v981_v38  ;;  %v1310_v49 = vpack.c.bf16 %v525_v43, %v522_v35  ;;  %v944_v50 = vadd.f32 %v943_v37, %v525_v43  ;;  %v982_v51 = vmul.f32 %v525_v43, %v525_v43 }
 0x117   : > { %1363 = vst [vmem:[%s1629_s11 + $0x38] sm:$0xff] %v1315_v42   ;;  %1371 = vst [vmem:[%s1629_s11 + $0x78] sm:$0xff] %v1355_v44   ;;  %v1350_v52 = vpack.c.bf16 %v589_v45, %v586_v36  ;;  %v998_v39 = vmul.f32 %v589_v45, %v589_v45  ;;  %v1000_v42 = vmul.f32 %v1677_v41, %v1677_v41 }
 0x118   : > { %1362 = vst [vmem:[%s1629_s11 + $0x30] sm:$0xff] %v1310_v49   ;;  %v945_v55 = vadd.f32 %v1426_v31, %v944_v50  ;;  %v1013_v56 = vadd.f32 %v1012_v47, %v982_v51 }
 0x119   : > { %1370 = vst [vmem:[%s1629_s11 + $0x70] sm:$0xff] %v1350_v52  }
 0x11a   : > { %v1014_v59 = vadd.f32 %v1013_v56, %v983_v54  ;;  %v946_v60 = vadd.f32 %v1427_v40, %v945_v55 }
 0x11c   : > { %v947_v62 = vadd.f32 %v946_v60, %v1622_v27  ;;  %v1015_v63 = vadd.f32 %v1014_v59, %v984_v58  ;;  %v989_v27 = vmul.f32 %v1645_v48, %v1645_v48 }
 0x11e   : > { %v1016_v0 = vadd.f32 %v1015_v63, %v985_v61  ;;  %v948_v1 = vadd.f32 %v947_v62, %v1635_v34 }
 0x120   : > { %v949_v4 = vadd.f32 %v1620_v25, %v948_v1  ;;  %v1017_v5 = vadd.f32 %v1016_v0, %v986_v2  ;;  %v991_v25 = vmul.f32 %v1643_v46, %v1643_v46 }
 0x122   : > { %v1018_v9 = vadd.f32 %v1017_v5, %v987_v3  ;;  %v950_v10 = vadd.f32 %v1631_v29, %v949_v4  ;;  %v992_v29 = vmul.f32 %v1647_v53, %v1647_v53 }
 0x124   : > { %v951_v11 = vadd.f32 %v950_v10, %v1645_v48  ;;  %v1019_v12 = vadd.f32 %v1018_v9, %v988_v7  ;;  %v993_v48 = vmul.f32 %v1661_v8, %v1661_v8 }
 0x126   : > { %v1020_v14 = vadd.f32 %v1019_v12, %v989_v27  ;;  %v952_v34 = vadd.f32 %v951_v11, %v1651_v57 }
 0x128   : > { %v953_v16 = vadd.f32 %v1643_v46, %v952_v34  ;;  %v1021_v18 = vadd.f32 %v1020_v14, %v990_v15  ;;  %v995_v46 = vmul.f32 %v1659_v6, %v1659_v6 }
 0x12a   : > { %v1022_v19 = vadd.f32 %v1021_v18, %v991_v25  ;;  %v954_v20 = vadd.f32 %v1647_v53, %v953_v16  ;;  %v996_v53 = vmul.f32 %v1663_v13, %v1663_v13 }
 0x12c   : > { %v955_v21 = vadd.f32 %v954_v20, %v1661_v8  ;;  %v1023_v22 = vadd.f32 %v1022_v19, %v992_v29  ;;  %v997_v8 = vmul.f32 %v586_v36, %v586_v36 }
 0x12e   : > { %v1024_v23 = vadd.f32 %v1023_v22, %v993_v48  ;;  %v956_v57 = vadd.f32 %v955_v21, %v1667_v17  ;;  %v999_v17 = vmul.f32 %v1675_v33, %v1675_v33 }
 0x130   : > { %v957_v26 = vadd.f32 %v1659_v6, %v956_v57  ;;  %v1025_v28 = vadd.f32 %v1024_v23, %v994_v24 }
 0x132   : > { %v1026_v30 = vadd.f32 %v1025_v28, %v995_v46  ;;  %v958_v31 = vadd.f32 %v1663_v13, %v957_v26 }
 0x134   : > { %v959_v32 = vadd.f32 %v958_v31, %v586_v36  ;;  %v1027_v35 = vadd.f32 %v1026_v30, %v996_v53 }
 0x136   : > { %v1028_v37 = vadd.f32 %v1027_v35, %v997_v8  ;;  %v960_v38 = vadd.f32 %v959_v32, %v589_v45 }
 0x138   : > { %v961_v40 = vadd.f32 %v1675_v33, %v960_v38  ;;  %v1029_v6 = vadd.f32 %v1028_v37, %v998_v39 }
 0x13a   : > { %v962_v43 = vadd.f32 %v1677_v41, %v961_v40  ;;  %v1030_v44 = vadd.f32 %v1029_v6, %v999_v17 }
 0x13c   : > { %v963_v13 = vrot.slane %v962_v43, 4  ;;  %v1031_v47 = vadd.f32 %v1030_v44, %v1000_v42 }
 0x13e   : > { %v964_v36 = vadd.f32 %v963_v13, %v962_v43  ;;  %v1032_v49 = vrot.slane %v1031_v47, 4 }
 0x140   : > { %v965_v50 = vrot.slane %v964_v36, 2  ;;  %v1033_v51 = vadd.f32 %v1032_v49, %v1031_v47 }
 0x142   : > { %v966_v45 = vadd.f32 %v965_v50, %v964_v36  ;;  %v1034_v52 = vrot.slane %v1033_v51, 2 }
 0x144   : > { %v967_v54 = vrot.slane %v966_v45, 1  ;;  %v1035_v55 = vadd.f32 %v1034_v52, %v1033_v51 }
 0x146   : > { %v1036_v56 = vrot.slane %v1035_v55, 1  ;;  %v968_v33 = vadd.f32 %v967_v54, %v966_v45 }
 0x148   : > { %v1037_v41 = vadd.f32 %v1036_v56, %v1035_v55 }
 0x14a   : > { %v1039_v58 = vsel %vm1038_vm0, %v968_v33, %v1037_v41 }
 0x14b   : > { %1040 = vst [vmem:[%s246_s19] sm:$0x3] %v1039_v58 }
 0x14c PF: > { %s14_s14 = sadd.s32 1, %s1530_s14   ;;  %s1744_s12 = smov %s1526_s13 }
 0x14d   : > { %p11_p5 = scmp.ge.s32.totalorder %s14_s14, 4   ;;  %s1745_s13 = smov %s1747_s15 }
 0x14f   :  { %13 = sbr.rel (!%p11_p5) target bundleno = 2 (0x2), region = 82 }

</bundles_post_ra>
